<compile_context>
chip_gen: v7x
topology: tpu7x:2x2x1
jax: 0.10.0
libtpu: 0.0.40
codegen_flags: <defaults>
</compile_context>

<pallas_src>
import functools

import jax
import jax.numpy as jnp
from jax.experimental import pallas as pl
from jax.experimental.pallas import tpu as pltpu

EPS = 1e-5                       # BatchNorm2d default eps
VMEM_LIMIT = 32 * 1024 * 1024    # explicit scoped-VMEM budget (safe on v5e/v6e/v7x)


def _scale_shift(mean, var, gamma, beta):
    inv = gamma / jnp.sqrt(var + EPS)
    return inv.reshape(1, -1), (beta - mean * inv).reshape(1, -1)


def _pick_tile_m(nhw):
    # 512-2048 rows keeps the row-tiled 1x1 matmul near the HBM roofline while
    # two double-buffered f32 tiles stay far below the 32 MiB scoped-VMEM
    # default (v7x has only 64 MiB physical VMEM per core).
    if nhw >= 8192:
        return 1024
    if nhw >= 512:
        return 256          # small demo shapes: still exercise a multi-tile grid
    return max(8, nhw)


# ---------------------------------------------------------------------------
# Kernel 1: fused BN1 (training-mode stats -> scale/shift) + ReLU + 1x1 conv.
# Row-tiled matmul over the flattened spatial positions; also emits per-tile
# partial (sum, sum-of-squares) of the conv output so BN2 stats are free.
# ---------------------------------------------------------------------------
def _bn_relu_conv1x1_kernel(x_ref, w_ref, scale_ref, shift_ref,
                            mid_ref, stats_ref, *, total_rows):
    tile_m = x_ref.shape[0]
    act = jnp.maximum(x_ref[...] * scale_ref[...] + shift_ref[...], 0.0)
    out = jnp.dot(act.astype(jnp.bfloat16), w_ref[...],
                  preferred_element_type=jnp.float32)          # bf16 MXU, f32 acc
    mid_ref[...] = out.astype(mid_ref.dtype)

    # Partial BN2 statistics of the conv OUTPUT (pre-BN2). Mask rows of a
    # possibly partial last tile (out-of-bounds rows carry undefined data).
    row = jax.lax.broadcasted_iota(jnp.int32, out.shape, 0) + pl.program_id(0) * tile_m
    out_m = jnp.where(row < total_rows, out, 0.0)
    s1 = jnp.sum(out_m, axis=0, keepdims=True)                 # (1, Cmid)
    s2 = jnp.sum(out_m * out_m, axis=0, keepdims=True)         # (1, Cmid)
    stats_ref[...] = jnp.concatenate([s1, s2], axis=0)[None, :, :]


# ---------------------------------------------------------------------------
# Kernel 2: fused BN2 + ReLU + 3x3 conv (padding=1) + channel-concat with x.
# One batch element per grid step. im2col into VMEM, single deep-K matmul.
# ---------------------------------------------------------------------------
def _bn_relu_conv3x3_concat_kernel(x_ref, mid_ref, w_ref, scale_ref, shift_ref,
                                   out_ref, xpad_ref, col_ref):
    _, H, W, Cm = mid_ref.shape
    Cin = x_ref.shape[-1]
    Co = w_ref.shape[-1]

    # BN2 + ReLU on this batch element.
    act = jnp.maximum(mid_ref[0] * scale_ref[...] + shift_ref[...], 0.0)

    # Zero ONLY the 1-pixel halo of the padded scratch (not the whole buffer).
    # Done every step so it stays correct when the "parallel" batch axis is
    # sharded across TensorCores (each core owns its own scratch and may never
    # see program_id == 0).
    zrow = jnp.zeros((1, W + 2, Cm), xpad_ref.dtype)
    zcol = jnp.zeros((H + 2, 1, Cm), xpad_ref.dtype)
    xpad_ref[0:1, :, :] = zrow
    xpad_ref[H + 1:H + 2, :, :] = zrow
    xpad_ref[:, 0:1, :] = zcol
    xpad_ref[:, W + 1:W + 2, :] = zcol
    xpad_ref[1:H + 1, 1:W + 1, :] = act.astype(xpad_ref.dtype)

    # im2col: 9 shifted windows -> one (H*W, 9*Cm) bf16 buffer, then a single
    # deep-contraction matmul (K = 9*Cm) instead of 9 shallow matmuls
    # accumulated in live registers.
    for dy in range(3):
        for dx in range(3):
            t = dy * 3 + dx
            win = xpad_ref[dy:dy + H, dx:dx + W, :]             # (H, W, Cm)
            col_ref[:, t * Cm:(t + 1) * Cm] = (
                win.reshape(H * W, Cm).astype(col_ref.dtype))

    conv = jnp.dot(col_ref[...], w_ref[...],
                   preferred_element_type=jnp.float32)          # (H*W, Co)
    conv = conv.reshape(H, W, Co).astype(out_ref.dtype)

    # Fused channel concat: out = [x, conv3x3(...)] -- no separate XLA concat.
    out_ref[0, :, :, 0:Cin] = x_ref[0].astype(out_ref.dtype)
    out_ref[0, :, :, Cin:Cin + Co] = conv


# ---------------------------------------------------------------------------
# Wrappers
# ---------------------------------------------------------------------------
def fused_bn_relu_conv1x1(x_nhwc, gamma, beta, w_bf16):
    N, H, W, Cin = x_nhwc.shape
    Cmid = w_bf16.shape[-1]
    nhw = N * H * W

    # BN1 (training-mode, biased stats) in ONE fused pass: mean and E[x^2].
    m1 = jnp.mean(x_nhwc, axis=(0, 1, 2))
    m2 = jnp.mean(jnp.square(x_nhwc), axis=(0, 1, 2))
    scale, shift = _scale_shift(m1, jnp.maximum(m2 - m1 * m1, 0.0), gamma, beta)

    tile_m = _pick_tile_m(nhw)
    grid = (pl.cdiv(nhw, tile_m),)
    x_flat = x_nhwc.reshape(nhw, Cin)

    mid, stats = pl.pallas_call(
        functools.partial(_bn_relu_conv1x1_kernel, total_rows=nhw),
        out_shape=(
            jax.ShapeDtypeStruct((nhw, Cmid), jnp.float32),
            jax.ShapeDtypeStruct((grid[0], 2, Cmid), jnp.float32),
        ),
        grid=grid,
        in_specs=[
            pl.BlockSpec((tile_m, Cin), lambda i: (i, 0)),
            pl.BlockSpec((Cin, Cmid), lambda i: (0, 0)),
            pl.BlockSpec((1, Cin), lambda i: (0, 0)),
            pl.BlockSpec((1, Cin), lambda i: (0, 0)),
        ],
        out_specs=(
            pl.BlockSpec((tile_m, Cmid), lambda i: (i, 0)),
            pl.BlockSpec((1, 2, Cmid), lambda i: (i, 0, 0)),
        ),
        compiler_params=pltpu.CompilerParams(
            dimension_semantics=("parallel",),
            vmem_limit_bytes=VMEM_LIMIT),
    )(x_flat, w_bf16, scale, shift)

    # Reduce the tiny per-tile partials -> BN2 batch statistics
    # (no extra full HBM pass over `mid`).
    cnt = jnp.float32(nhw)
    mean2 = stats[:, 0, :].sum(axis=0) / cnt
    var2 = jnp.maximum(stats[:, 1, :].sum(axis=0) / cnt - mean2 * mean2, 0.0)
    return mid.reshape(N, H, W, Cmid), mean2, var2


def fused_bn_relu_conv3x3_concat(x_nhwc, mid_nhwc, mean2, var2, gamma, beta, w9_bf16):
    N, H, W, Cm = mid_nhwc.shape
    Cin = x_nhwc.shape[-1]
    Co = w9_bf16.shape[-1]
    scale, shift = _scale_shift(mean2, var2, gamma, beta)

    return pl.pallas_call(
        _bn_relu_conv3x3_concat_kernel,
        out_shape=jax.ShapeDtypeStruct((N, H, W, Cin + Co), x_nhwc.dtype),
        grid=(N,),
        in_specs=[
            pl.BlockSpec((1, H, W, Cin), lambda n: (n, 0, 0, 0)),
            pl.BlockSpec((1, H, W, Cm), lambda n: (n, 0, 0, 0)),
            pl.BlockSpec((9 * Cm, Co), lambda n: (0, 0)),
            pl.BlockSpec((1, Cm), lambda n: (0, 0)),
            pl.BlockSpec((1, Cm), lambda n: (0, 0)),
        ],
        out_specs=pl.BlockSpec((1, H, W, Cin + Co), lambda n: (n, 0, 0, 0)),
        scratch_shapes=[
            pltpu.VMEM((H + 2, W + 2, Cm), jnp.float32),   # zero-halo activation
            pltpu.VMEM((H * W, 9 * Cm), jnp.bfloat16),     # im2col buffer
        ],
        compiler_params=pltpu.CompilerParams(
            dimension_semantics=("parallel",),
            vmem_limit_bytes=VMEM_LIMIT),
    )(x_nhwc, mid_nhwc, w9_bf16, scale, shift)


class DenseBlockPallas:
    """DenseBlock(input_num_planes, rate_inc) with deterministic parameters."""

    def __init__(self, input_num_planes, rate_inc, key):
        c_in, c_mid, c_out = input_num_planes, 4 * rate_inc, rate_inc
        k1, k2, k3, k4, k5, k6 = jax.random.split(key, 6)
        # f32 master weights (for the reference), kernel layouts:
        #   w1: (Cin, Cmid) "IO" for the 1x1; w2: (3,3,Cmid,Cout) "HWIO".
        self.w1 = jax.random.normal(k1, (c_in, c_mid), jnp.float32) * 0.2
        self.w2 = jax.random.normal(k2, (3, 3, c_mid, c_out), jnp.float32) * 0.1
        # Host-side pre-cast / pre-reshape of the kernel operands (free).
        self.w1_bf16 = self.w1.astype(jnp.bfloat16)
        self.w2_bf16 = self.w2.reshape(9 * c_mid, c_out).astype(jnp.bfloat16)
        # BN params (batch_norm2 synthesized — missing from the torch __init__).
        self.gamma1 = 1.0 + 0.1 * jax.random.normal(k3, (c_in,), jnp.float32)
        self.beta1 = 0.1 * jax.random.normal(k4, (c_in,), jnp.float32)
        self.gamma2 = 1.0 + 0.1 * jax.random.normal(k5, (c_mid,), jnp.float32)
        self.beta2 = 0.1 * jax.random.normal(k6, (c_mid,), jnp.float32)

    def __call__(self, x_nchw):
        # TODO(synk): fold the NCHW<->NHWC boundary transposes into the kernels'
        # BlockSpecs if the surrounding model cannot stay channels-last.
        x_nhwc = jnp.transpose(x_nchw, (0, 2, 3, 1))
        mid, mean2, var2 = fused_bn_relu_conv1x1(
            x_nhwc, self.gamma1, self.beta1, self.w1_bf16)
        out_nhwc = fused_bn_relu_conv3x3_concat(
            x_nhwc, mid, mean2, var2, self.gamma2, self.beta2, self.w2_bf16)
        return jnp.transpose(out_nhwc, (0, 3, 1, 2))


# ---------------------------------------------------------------------------
# Pure-JAX reference (lax.conv, NHWC). Mirrors the kernels' bf16 operand
# rounding so the comparison tolerance stays at the bf16 level.
# ---------------------------------------------------------------------------
def reference(x_nchw, blk: DenseBlockPallas):
    def bf16r(v):
        return v.astype(jnp.bfloat16).astype(jnp.float32)

    def bn_relu(v, gamma, beta):
        mean = jnp.mean(v, axis=(0, 1, 2))
        var = jnp.var(v, axis=(0, 1, 2))
        return jnp.maximum((v - mean) * (gamma / jnp.sqrt(var + EPS)) + beta, 0.0)

    x = jnp.transpose(x_nchw, (0, 2, 3, 1))
    y1 = jax.lax.conv_general_dilated(
        bf16r(bn_relu(x, blk.gamma1, blk.beta1)), bf16r(blk.w1[None, None]),
        (1, 1), "VALID", dimension_numbers=("NHWC", "HWIO", "NHWC"))
    y2 = jax.lax.conv_general_dilated(
        bf16r(bn_relu(y1, blk.gamma2, blk.beta2)), bf16r(blk.w2),
        (1, 1), ((1, 1), (1, 1)), dimension_numbers=("NHWC", "HWIO", "NHWC"))
    out = jnp.concatenate([x, y2], axis=-1)
    return jnp.transpose(out, (0, 3, 1, 2))


if __name__ == "__main__":
    key = jax.random.PRNGKey(0)
    kx, kp = jax.random.split(key)

    N, C, H, W = 2, 4, 16, 16        # input_num_planes = 4
    rate_inc = 4                      # conv1 -> 16 ch, conv2 -> 4 ch, output 8 ch
    x = jax.random.normal(kx, (N, C, H, W), jnp.float32)

    block = DenseBlockPallas(input_num_planes=C, rate_inc=rate_inc, key=kp)

    out = jax.block_until_ready(block(x))
    assert out.shape == (N, C + rate_inc, H, W), out.shape

    ref = jax.block_until_ready(reference(x, block))
    # bf16 MXU operands (f32 accumulation) -> compare at bf16-level tolerance.
    max_err = float(jnp.max(jnp.abs(out - ref)))
    assert jnp.allclose(out, ref, atol=1e-2, rtol=1e-2), max_err

    print("KERNEL_OK")
</pallas_src>

<mosaic_0001>
module attributes {stable_mosaic.version = 11 : i64} {
  func.func @_bn_relu_conv1x1_kernel(%arg0: i32, %arg1: memref<256x4xf32, #tpu.memory_space<vmem>>, %arg2: memref<4x16xbf16, #tpu.memory_space<vmem>>, %arg3: memref<1x4xf32, #tpu.memory_space<vmem>>, %arg4: memref<1x4xf32, #tpu.memory_space<vmem>>, %arg5: memref<256x16xf32, #tpu.memory_space<vmem>>, %arg6: memref<1x2x16xf32, #tpu.memory_space<vmem>>) attributes {dimension_semantics = [#tpu.dimension_semantics<parallel>], iteration_bounds = array<i64: 2>, scalar_prefetch = 0 : i64, scratch_operands = 0 : i64, tpu.core_type = #tpu.core_type<tc>, window_params = [{transform_indices = @transform_0, window_bounds = array<i64: 256, 4>}, {pipeline_mode = #tpu.pipeline_mode<synchronous>, transform_indices = @transform_1, window_bounds = array<i64: 4, 16>}, {pipeline_mode = #tpu.pipeline_mode<synchronous>, transform_indices = @transform_2, window_bounds = array<i64: 1, 4>}, {pipeline_mode = #tpu.pipeline_mode<synchronous>, transform_indices = @transform_3, window_bounds = array<i64: 1, 4>}, {transform_indices = @transform_4, window_bounds = array<i64: 256, 16>}, {transform_indices = @transform_5, window_bounds = array<i64: 1, 2, 16>}]} {
    %c0 = arith.constant 0 : index
    %c0_0 = arith.constant 0 : index
    %0 = vector.load %arg1[%c0, %c0_0] : memref<256x4xf32, #tpu.memory_space<vmem>>, vector<256x4xf32>
    %c0_1 = arith.constant 0 : index
    %c0_2 = arith.constant 0 : index
    %1 = vector.load %arg3[%c0_1, %c0_2] : memref<1x4xf32, #tpu.memory_space<vmem>>, vector<1x4xf32>
    %2 = vector.broadcast %1 : vector<1x4xf32> to vector<256x4xf32>
    %3 = arith.mulf %0, %2 : vector<256x4xf32>
    %c0_3 = arith.constant 0 : index
    %c0_4 = arith.constant 0 : index
    %4 = vector.load %arg4[%c0_3, %c0_4] : memref<1x4xf32, #tpu.memory_space<vmem>>, vector<1x4xf32>
    %5 = vector.broadcast %4 : vector<1x4xf32> to vector<256x4xf32>
    %6 = arith.addf %3, %5 : vector<256x4xf32>
    %cst = arith.constant 0.000000e+00 : f32
    %7 = vector.broadcast %cst : f32 to vector<256x4xf32>
    %8 = arith.maximumf %6, %7 : vector<256x4xf32>
    %9 = arith.truncf %8 : vector<256x4xf32> to vector<256x4xbf16>
    %c0_5 = arith.constant 0 : index
    %c0_6 = arith.constant 0 : index
    %10 = vector.load %arg2[%c0_5, %c0_6] : memref<4x16xbf16, #tpu.memory_space<vmem>>, vector<4x16xbf16>
    %cst_7 = arith.constant dense<0.000000e+00> : vector<256x16xf32>
    %11 = tpu.matmul %9, %10, %cst_7 {dimension_numbers = #tpu.dot_dimension_numbers<[1], [0], [0], [1], [0, 0, 1, 1], [], []>} : vector<256x4xbf16>, vector<4x16xbf16>, vector<256x16xf32> -> vector<256x16xf32>
    %c0_8 = arith.constant 0 : index
    %c0_9 = arith.constant 0 : index
    %12 = vector.load %arg5[%c0_8, %c0_9] : memref<256x16xf32, #tpu.memory_space<vmem>>, vector<256x16xf32>
    tpu.vector_store %arg5[%c0_8, %c0_9], %11 {strides = array<i32>} : memref<256x16xf32, #tpu.memory_space<vmem>>, vector<256x16xf32>,
    %13 = tpu.iota {dimensions = array<i32: 0>} : vector<256x16xi32>
    %c256_i32 = arith.constant 256 : i32
    %14 = arith.muli %arg0, %c256_i32 : i32
    %15 = vector.broadcast %14 : i32 to vector<256x16xi32>
    %16 = arith.addi %13, %15 : vector<256x16xi32>
    %c512_i32 = arith.constant 512 : i32
    %17 = vector.broadcast %c512_i32 : i32 to vector<256x16xi32>
    %18 = arith.cmpi slt, %16, %17 : vector<256x16xi32>
    %cst_10 = arith.constant 0.000000e+00 : f32
    %19 = vector.broadcast %cst_10 : f32 to vector<256x16xf32>
    %20 = arith.select %18, %11, %19 : vector<256x16xi1>, vector<256x16xf32>
    %cst_11 = arith.constant dense<0.000000e+00> : vector<16xf32>
    %21 = vector.multi_reduction <add>, %20, %cst_11 [0] : vector<256x16xf32> to vector<16xf32>
    %22 = vector.shape_cast %21 : vector<16xf32> to vector<1x16xf32>
    %23 = arith.mulf %20, %20 : vector<256x16xf32>
    %cst_12 = arith.constant dense<0.000000e+00> : vector<16xf32>
    %24 = vector.multi_reduction <add>, %23, %cst_12 [0] : vector<256x16xf32> to vector<16xf32>
    %25 = vector.shape_cast %24 : vector<16xf32> to vector<1x16xf32>
    %26 = tpu.concatenate %22, %25 in 0 : vector<1x16xf32>, vector<1x16xf32> -> vector<2x16xf32>
    %27 = vector.shape_cast %26 : vector<2x16xf32> to vector<1x2x16xf32>
    %c0_13 = arith.constant 0 : index
    %c0_14 = arith.constant 0 : index
    %c0_15 = arith.constant 0 : index
    %28 = vector.load %arg6[%c0_13, %c0_14, %c0_15] : memref<1x2x16xf32, #tpu.memory_space<vmem>>, vector<1x2x16xf32>
    tpu.vector_store %arg6[%c0_13, %c0_14, %c0_15], %27 {strides = array<i32>} : memref<1x2x16xf32, #tpu.memory_space<vmem>>, vector<1x2x16xf32>,
    return
  }
  func.func @transform_0(%arg0: i32) -> (i32, i32) {
    %c0_i32 = arith.constant 0 : i32
    %c0_i32_0 = arith.constant 0 : i32
    return %arg0, %c0_i32 : i32, i32
  }
  func.func @transform_1(%arg0: i32) -> (i32, i32) {
    %c0_i32 = arith.constant 0 : i32
    %c0_i32_0 = arith.constant 0 : i32
    %c0_i32_1 = arith.constant 0 : i32
    return %c0_i32, %c0_i32_0 : i32, i32
  }
  func.func @transform_2(%arg0: i32) -> (i32, i32) {
    %c0_i32 = arith.constant 0 : i32
    %c0_i32_0 = arith.constant 0 : i32
    %c0_i32_1 = arith.constant 0 : i32
    return %c0_i32, %c0_i32_0 : i32, i32
  }
  func.func @transform_3(%arg0: i32) -> (i32, i32) {
    %c0_i32 = arith.constant 0 : i32
    %c0_i32_0 = arith.constant 0 : i32
    %c0_i32_1 = arith.constant 0 : i32
    return %c0_i32, %c0_i32_0 : i32, i32
  }
  func.func @transform_4(%arg0: i32) -> (i32, i32) {
    %c0_i32 = arith.constant 0 : i32
    %c0_i32_0 = arith.constant 0 : i32
    return %arg0, %c0_i32 : i32, i32
  }
  func.func @transform_5(%arg0: i32) -> (i32, i32, i32) {
    %c0_i32 = arith.constant 0 : i32
    %c0_i32_0 = arith.constant 0 : i32
    %c0_i32_1 = arith.constant 0 : i32
    return %arg0, %c0_i32, %c0_i32_0 : i32, i32, i32
  }
}

</mosaic_0001>

<bundles_post_ra>
// kernel: tpu_custom_call.1
= control target key start
LH: loop header
LB: loop body
LE: loop exit
PB: predicated region body
PF: predicated region fallthrough
CT: control target
= control target key end

     0   :  { %11 = vsyncpa [#allocation3], 0  ;;  %s1907_s0 = inlined_call_operand.vmem [shape: f32[512,4], index: 0, kind: input, shape index: {}]   ;;  %s1908_s1 = inlined_call_operand.vmem [shape: bf16[4,16], index: 1, kind: input, shape index: {}]   ;;  %s1909_s2 = inlined_call_operand.vmem [shape: f32[1,4], index: 2, kind: input, shape index: {}]   ;;  %s1910_s3 = inlined_call_operand.vmem [shape: f32[1,4], index: 3, kind: input, shape index: {}]   ;;  %s1911_s4 = inlined_call_operand.vmem [shape: f32[512,16], index: 4, kind: output, shape index: {0}]   ;;  %s1912_s5 = inlined_call_operand.hbm [shape: f32[2,2,16], index: 5, kind: output, shape index: {1}]  }
   0x1   :  { %13 = vsyncpa [#allocation3 + $0x1], 0  ;;  %s1279_s18 = smov 0   ;;  %s1281_s19 = smov 0  }
   0x2   :  { %s1283_s20 = smov 0   ;;  %s1285_s21 = smov 0  }
   0x3 LB: > { %s1300_s22 = sadd.s32 4294967295, %s1246_s21   ;;  %s1058_s23 = sadd.s32 4294967294, %s1246_s21   ;;  %s1246_s21 = sphi %s1285_s21, %s1918_s21   ;;  %s1242_s20 = sphi %s1283_s20, %s1917_s20   ;;  %s1238_s19 = sphi %s1281_s19, %s1916_s19   ;;  %s1234_s18 = sphi %s1279_s18, %s1915_s18  }
   0x4   : > { %s1304_s24 = sadd.s32 1, %s1246_s21   ;;  %s141_s25 = sadd.s32 1, %s1242_s20 }
   0x5   : > { %s138_s26 = ssub.s32 %s1246_s21, %s1304_s24  ;;  %p151_p0 = scmp.ne.s32.totalorder %s1242_s20, %s1238_s19 }
   0x6   : > { %p139_p1 = scmp.eq.s32.totalorder %s138_s26, 0  ;;  %p152_p2 = scmp.eq.s32.totalorder %s1300_s22, 1 }
   0x7   : > { %p157_p3 = scmp.ne.s32.totalorder %s1238_s19, %s1234_s18  ;;  %p158_p4 = scmp.eq.s32.totalorder %s1058_s23, 1 }
   0x8   : > { %s1315_s27 = scalar_select %p139_p1, %s1242_s20, %s141_s25  }
   0x9   : > { %p1317_p5 = por %p152_p2, %p151_p0  ;;  %p1321_p6 = por %p158_p4, %p157_p3 }
   0xa   : > { %p1061_p7 = scmp.ge.s32.totalorder %s1246_s21, 1  ;;  %p194_p8 = scmp.lt.s32.totalorder %s1246_s21, 3 }
   0xc   : > { %p195_p9 = pnand %p1061_p7, %p194_p8 }
   0xd   : > { %v398_v0 = vld [vmem:[%s1908_s1] sm:$0x3] (!%p195_p9)  ;;  %vm448_vm0 = vcmask (!%p195_p9), 1041408   ;;  %s1331_s7 = sshll.u32 (!%p195_p9), %s1300_s22, 5  ;;  %vm399_vm1 = vcmask (!%p195_p9), 31744   ;;  %s1085_s17 = sshll.u32 (!%p195_p9), %s1300_s22, 8 }
   0xe   : > { %198 = sbr.rel (%p195_p9) target bundleno = 343 (0x157), region = 36  ;;  %1143 = vmatprep.subr.msk.bf16.mxu0 (!%p195_p9), %vm448_vm0, %v398_v0  ;;  %v450_v1 = vsel (!%p195_p9), %vm448_vm0, %v398_v0, 0  ;;  %p228_p10 = scmp.lt.s32.totalorder (!%p195_p9), %s1331_s7, 63  ;;  %1144 = vmatprep.subr.msk.bf16.mxu1 (!%p195_p9), %vm448_vm0, %v398_v0  ;;  %v1341_v2 = vld [vmem:[%s1909_s2] ss:$0 sm:$0xff] (!%p195_p9)  ;;  %vm613_vm2 = vcmask (!%p195_p9), 130048  }
   0xf   : > { %1108 = vmatpush3.bf16.msra.mxu0 (!%p195_p9), %v450_v1  ;;  %1142 = vmatpush3.bf16.msra.mxu1 (!%p195_p9), %v450_v1  ;;  %v1353_v3 = vld [vmem:[%s1910_s3] ss:$0 sm:$0xff] (!%p195_p9)  ;;  %s224_s26 = sand.u32 (!%p195_p9), 1, %s1238_s19   ;;  %s1865_s11 = scalar_lea.hbm (!%p195_p9), %s1912_s5, %s1331_s7 }
  0x10   : > { %s1062_s30 = sshll.u32 (!%p195_p9), %s224_s26, 1  ;;  %s957_s12 = scalar_lea.sflag (!%p195_p9), [#allocation3], %s224_s26 }
  0x11   : > { %s226_s6 = scalar_lea.vmem (!%p195_p9), [#allocation2], %s1062_s30 }
  0x15   : > { %s1335_s8 = scalar_select %p228_p10, %s1331_s7, 63 }
  0x17   : > { %s1064_s9 = sshll.u32 %s1335_s8, 3  ;;  %s974_s8 = sshll.u32 %s226_s6, 4  ;;  %s1867_s8 = int_to_ptr.vmem [resolvable:$true] %s974_s8 }
  0x18   : > { %s1348_s14 = scalar_lea.vmem %s1907_s0, %s1064_s9  ;;  %s1501_s25 = scalar_lea.vmem %s1911_s4, %s1064_s9 }
  0x19   : > { %v240_v4 = vld [vmem:[%s1348_s14] sm:$0xff]  ;;  %v241_v5 = vld [vmem:[%s1348_s14 + $0x8] sm:$0xff]  ;;  %v242_v6 = vld [vmem:[%s1348_s14 + $0x10] sm:$0xff]  ;;  %s1184_s13 = scalar_lea.vmem %s1867_s8, 32 }
  0x1a   : > { %v279_v7 = vmul.f32 %v1341_v2, %v240_v4  ;;  %v280_v8 = vmul.f32 %v1341_v2, %v241_v5  ;;  %v243_v9 = vld [vmem:[%s1348_s14 + $0x18] sm:$0xff]  ;;  %v281_v10 = vmul.f32 %v1341_v2, %v242_v6  ;;  %v244_v11 = vld [vmem:[%s1348_s14 + $0x20] sm:$0xff]  ;;  %v245_v12 = vld [vmem:[%s1348_s14 + $0x28] sm:$0xff]  ;;  %p1185_p11 = scmp.ne.s32.totalorder %s1867_s8, %s1184_s13 }
  0x1b   : > { %v282_v13 = vmul.f32 %v1341_v2, %v243_v9  ;;  %v283_v14 = vmul.f32 %v1341_v2, %v244_v11  ;;  %v284_v15 = vmul.f32 %v1341_v2, %v245_v12  ;;  %v246_v16 = vld [vmem:[%s1348_s14 + $0x30] sm:$0xff]  ;;  %v247_v17 = vld [vmem:[%s1348_s14 + $0x38] sm:$0xff]  ;;  %v248_v26 = vld [vmem:[%s1348_s14 + $0x40] sm:$0xff] }
  0x1c   : > { %v318_v18 = vadd.f32 %v1353_v3, %v279_v7  ;;  %v319_v19 = vadd.f32 %v1353_v3, %v280_v8  ;;  %v320_v20 = vadd.f32 %v1353_v3, %v281_v10  ;;  %v285_v21 = vmul.f32 %v1341_v2, %v246_v16  ;;  %v249_v27 = vld [vmem:[%s1348_s14 + $0x48] sm:$0xff]  ;;  %v250_v32 = vld [vmem:[%s1348_s14 + $0x50] sm:$0xff]  ;;  %v251_v37 = vld [vmem:[%s1348_s14 + $0x58] sm:$0xff]  ;;  %p1186_p12 = pnand %p1185_p11, %p1317_p5 }
  0x1d   : > { %v321_v22 = vadd.f32 %v1353_v3, %v282_v13  ;;  %v322_v23 = vadd.f32 %v1353_v3, %v283_v14  ;;  %v323_v24 = vadd.f32 %v1353_v3, %v284_v15  ;;  %v286_v25 = vmul.f32 %v1341_v2, %v247_v17  ;;  %v252_v38 = vld [vmem:[%s1348_s14 + $0x60] sm:$0xff]  ;;  %v253_v43 = vld [vmem:[%s1348_s14 + $0x68] sm:$0xff]  ;;  %v254_v44 = vld [vmem:[%s1348_s14 + $0x70] sm:$0xff] }
  0x1e   : > { %v350_v28 = vmax.f32 %v318_v18, 0.0  ;;  %v351_v29 = vmax.f32 %v319_v19, 0.0  ;;  %v352_v30 = vmax.f32 %v320_v20, 0.0  ;;  %v324_v31 = vadd.f32 %v1353_v3, %v285_v21  ;;  %v255_v53 = vld [vmem:[%s1348_s14 + $0x78] sm:$0xff]  ;;  %v256_v57 = vld [vmem:[%s1348_s14 + $0x80] sm:$0xff]  ;;  %v257_v62 = vld [vmem:[%s1348_s14 + $0x88] sm:$0xff]  ;;  %p1187_p13 = pneg %p1186_p12 }
  0x1f   : > { %v353_v33 = vmax.f32 %v321_v22, 0.0  ;;  %v354_v34 = vmax.f32 %v322_v23, 0.0  ;;  %v355_v35 = vmax.f32 %v323_v24, 0.0  ;;  %v325_v36 = vadd.f32 %v1353_v3, %v286_v25  ;;  %v258_v1 = vld [vmem:[%s1348_s14 + $0x90] sm:$0xff]  ;;  %v259_v4 = vld [vmem:[%s1348_s14 + $0x98] sm:$0xff]  ;;  %v260_v8 = vld [vmem:[%s1348_s14 + $0xa0] sm:$0xff] }
  0x20   : > { %v382_v39 = vpack.c.bf16 %v351_v29, %v350_v28  ;;  %v356_v40 = vmax.f32 %v324_v31, 0.0  ;;  %v287_v41 = vmul.f32 %v1341_v2, %v248_v26  ;;  %v288_v42 = vmul.f32 %v1341_v2, %v249_v27  ;;  %v261_v13 = vld [vmem:[%s1348_s14 + $0xa8] sm:$0xff]  ;;  %v262_v18 = vld [vmem:[%s1348_s14 + $0xb0] sm:$0xff]  ;;  %v263_v23 = vld [vmem:[%s1348_s14 + $0xb8] sm:$0xff] }
  0x21   : > { %v383_v45 = vpack.c.bf16 %v353_v33, %v352_v30  ;;  %v384_v46 = vpack.c.bf16 %v355_v35, %v354_v34  ;;  %v357_v47 = vmax.f32 %v325_v36, 0.0  ;;  %v289_v48 = vmul.f32 %v1341_v2, %v250_v32  ;;  %v264_v28 = vld [vmem:[%s1348_s14 + $0xc0] sm:$0xff]  ;;  %v265_v33 = vld [vmem:[%s1348_s14 + $0xc8] sm:$0xff] }
  0x22   : > { %1109 = vmatprep.mubr.msk.bf16.mxu0 %vm399_vm1, %v382_v39  ;;  %v326_v49 = vadd.f32 %v1353_v3, %v287_v41  ;;  %v327_v50 = vadd.f32 %v1353_v3, %v288_v42  ;;  %v290_v51 = vmul.f32 %v1341_v2, %v251_v37  ;;  %v291_v52 = vmul.f32 %v1341_v2, %v252_v38  ;;  %v266_v38 = vld [vmem:[%s1348_s14 + $0xd0] sm:$0xff] }
  0x23   : > { %1110 = vmatmul.mubr.msk.bf16.vlgmr.msra.gmra.mrb[0].mxu0 %vm399_vm1, %v383_v45  ;;  %v328_v54 = vadd.f32 %v1353_v3, %v289_v48  ;;  %v292_v55 = vmul.f32 %v1341_v2, %v253_v43  ;;  %v293_v56 = vmul.f32 %v1341_v2, %v254_v44  ;;  %v294_v0 = vmul.f32 %v1341_v2, %v255_v53  ;;  %v267_v43 = vld [vmem:[%s1348_s14 + $0xd8] sm:$0xff]  ;;  %v268_v48 = vld [vmem:[%s1348_s14 + $0xe0] sm:$0xff] }
  0x24   : > { %1113 = vmatprep.mubr.msk.bf16.mxu0 %vm399_vm1, %v384_v46  ;;  %v358_v58 = vmax.f32 %v326_v49, 0.0  ;;  %v359_v59 = vmax.f32 %v327_v50, 0.0  ;;  %v329_v60 = vadd.f32 %v1353_v3, %v290_v51  ;;  %v330_v61 = vadd.f32 %v1353_v3, %v291_v52  ;;  %v269_v49 = vld [vmem:[%s1348_s14 + $0xe8] sm:$0xff] }
  0x25   : > { %v331_v63 = vadd.f32 %v1353_v3, %v292_v55  ;;  %v385_v5 = vpack.c.bf16 %v357_v47, %v356_v40  ;;  %v360_v6 = vmax.f32 %v328_v54, 0.0  ;;  %v295_v7 = vmul.f32 %v1341_v2, %v256_v57 }
  0x26   : > { %v386_v9 = vpack.c.bf16 %v359_v59, %v358_v58  ;;  %v361_v10 = vmax.f32 %v329_v60, 0.0  ;;  %v1411_v11 = vadd.f32 %v1353_v3, %v293_v56  ;;  %v296_v12 = vmul.f32 %v1341_v2, %v257_v62 }
  0x27   : > { %v362_v14 = vmax.f32 %v330_v61, 0.0  ;;  %v334_v15 = vadd.f32 %v1353_v3, %v295_v7  ;;  %v297_v16 = vmul.f32 %v1341_v2, %v258_v1  ;;  %v298_v17 = vmul.f32 %v1341_v2, %v259_v4 }
  0x28   : > { %v363_v19 = vmax.f32 %v331_v63, 0.0  ;;  %v333_v20 = vadd.f32 %v1353_v3, %v294_v0  ;;  %v335_v21 = vadd.f32 %v1353_v3, %v296_v12  ;;  %v299_v22 = vmul.f32 %v1341_v2, %v260_v8  ;;  %v270_v8 = vld [vmem:[%s1348_s14 + $0xf0] sm:$0xff] }
  0x29   : > { %v366_v24 = vmax.f32 %v334_v15, 0.0  ;;  %v336_v25 = vadd.f32 %v1353_v3, %v297_v16  ;;  %v337_v26 = vadd.f32 %v1353_v3, %v298_v17  ;;  %v300_v27 = vmul.f32 %v1341_v2, %v261_v13 }
  0x2a   : > { %v387_v29 = vpack.c.bf16 %v361_v10, %v360_v6  ;;  %v367_v30 = vmax.f32 %v335_v21, 0.0  ;;  %v338_v31 = vadd.f32 %v1353_v3, %v299_v22  ;;  %v301_v32 = vmul.f32 %v1341_v2, %v262_v18 }
  0x2b   : > { %1114 = vmatmul.mubr.msk.bf16.gmra.mrb[4].mxu0 %vm399_vm1, %v385_v5  ;;  %v368_v34 = vmax.f32 %v336_v25, 0.0  ;;  %v369_v35 = vmax.f32 %v337_v26, 0.0  ;;  %v339_v36 = vadd.f32 %v1353_v3, %v300_v27  ;;  %v302_v37 = vmul.f32 %v1341_v2, %v263_v23 }
  0x2c   : > { %1117 = vmatprep.mubr.msk.bf16.mxu0 %vm399_vm1, %v386_v9  ;;  %v390_v39 = vpack.c.bf16 %v367_v30, %v366_v24  ;;  %v370_v40 = vmax.f32 %v338_v31, 0.0  ;;  %v340_v41 = vadd.f32 %v1353_v3, %v301_v32  ;;  %v303_v42 = vmul.f32 %v1341_v2, %v264_v28  ;;  %v271_v9 = vld [vmem:[%s1348_s14 + $0xf8] sm:$0xff]  ;;  %s1248_s14 = smov [#allocation2]  }
  0x2d   : > { %v391_v44 = vpack.c.bf16 %v369_v35, %v368_v34  ;;  %v371_v45 = vmax.f32 %v339_v36, 0.0  ;;  %v341_v46 = vadd.f32 %v1353_v3, %v302_v37  ;;  %v304_v47 = vmul.f32 %v1341_v2, %v265_v33  ;;  %s1188_s15 = sshll.u32 %s1248_s14, 4  ;;  %s1189_s15 = int_to_ptr.vmem [resolvable:$false] %s1188_s15 }
  0x2e   : > { %v388_v50 = vpack.c.bf16 %v363_v19, %v362_v14  ;;  %1125 = vmatprep.mubr.msk.bf16.mxu1 %vm399_vm1, %v390_v39  ;;  %v372_v51 = vmax.f32 %v340_v41, 0.0  ;;  %v342_v52 = vadd.f32 %v1353_v3, %v303_v42  ;;  %v305_v53 = vmul.f32 %v1341_v2, %v266_v38  ;;  %s1190_s16 = scalar_lea.vmem %s1189_s15, 64  ;;  %p1191_p0 = scmp.lt.s32.totalorder %s1867_s8, %s1189_s15 }
  0x2f   : > { %1126 = vmatmul.mubr.msk.bf16.vlgmr.msra.gmra.mrb[0].mxu1 %vm399_vm1, %v391_v44  ;;  %v392_v54 = vpack.c.bf16 %v371_v45, %v370_v40  ;;  %v373_v55 = vmax.f32 %v341_v46, 0.0  ;;  %v343_v56 = vadd.f32 %v1353_v3, %v304_v47  ;;  %v306_v57 = vmul.f32 %v1341_v2, %v267_v43  ;;  %p1192_p1 = scmp.lt.s32.totalorder %s1190_s16, %s1184_s13 }
  0x30   : > { %v374_v58 = vmax.f32 %v342_v52, 0.0  ;;  %v307_v59 = vmul.f32 %v1341_v2, %v268_v48  ;;  %v308_v60 = vmul.f32 %v1341_v2, %v269_v49  ;;  %v364_v62 = vmax.f32 %v1411_v11, 0.0 }
  0x31   : > { %1129 = vmatprep.mubr.msk.bf16.mxu1 %vm399_vm1, %v392_v54  ;;  %v375_v61 = vmax.f32 %v343_v56, 0.0  ;;  %v365_v63 = vmax.f32 %v333_v20, 0.0  ;;  %v393_v0 = vpack.c.bf16 %v373_v55, %v372_v51  ;;  %v344_v1 = vadd.f32 %v1353_v3, %v305_v53  ;;  %p1193_p2 = por %p1192_p1, %p1191_p0 }
  0x32   : > { %v345_v4 = vadd.f32 %v1353_v3, %v306_v57  ;;  %v346_v6 = vadd.f32 %v1353_v3, %v307_v59  ;;  %v347_v7 = vadd.f32 %v1353_v3, %v308_v60  ;;  %v309_v13 = vmul.f32 %v1341_v2, %v270_v8 }
  0x33   : > { %1118 = vmatmul.mubr.msk.bf16.gmra.mrb[8].mxu0 %vm399_vm1, %v387_v29  ;;  %v394_v5 = vpack.c.bf16 %v375_v61, %v374_v58  ;;  %v389_v10 = vpack.c.bf16 %v365_v63, %v364_v62  ;;  %v376_v12 = vmax.f32 %v344_v1, 0.0  ;;  %v310_v14 = vmul.f32 %v1341_v2, %v271_v9  ;;  %p1194_p3 = pnand %p1193_p2, %p1187_p13 }
  0x34   : > { %1121 = vmatprep.mubr.msk.bf16.mxu0 %vm399_vm1, %v388_v50  ;;  %v377_v11 = vmax.f32 %v345_v4, 0.0  ;;  %v378_v15 = vmax.f32 %v346_v6, 0.0  ;;  %v379_v16 = vmax.f32 %v347_v7, 0.0  ;;  %v348_v18 = vadd.f32 %v1353_v3, %v309_v13 }
  0x35   : > { %v349_v19 = vadd.f32 %v1353_v3, %v310_v14  ;;  %v646_v23 = vlaneseq  ;;  %v1474_v26 = vstv %s1085_s17 }
  0x36   : > { %v395_v17 = vpack.c.bf16 %v377_v11, %v376_v12  ;;  %v396_v20 = vpack.c.bf16 %v379_v16, %v378_v15  ;;  %v380_v21 = vmax.f32 %v348_v18, 0.0 }
  0x37   : > { %1130 = vmatmul.mubr.msk.bf16.gmra.mrb[4].mxu1 %vm399_vm1, %v393_v0  ;;  %v381_v22 = vmax.f32 %v349_v19, 0.0  ;;  %v1470_v24 = vshrl.u32 %v646_v23, 7 }
  0x38   : > { %1133 = vmatprep.mubr.msk.bf16.mxu1 %vm399_vm1, %v394_v5 }
  0x39   : > { %v397_v2 = vpack.c.bf16 %v381_v22, %v380_v21  ;;  %v649_v25 = vadd.s32 16, %v1470_v24  ;;  %v650_v3 = vadd.s32 24, %v1470_v24  ;;  %v648_v27 = vadd.s32 8, %v1470_v24 }
  0x3a   : > { %v653_v28 = vadd.s32 48, %v1470_v24  ;;  %v651_v29 = vadd.s32 32, %v1470_v24  ;;  %v654_v30 = vadd.s32 56, %v1470_v24  ;;  %v652_v31 = vadd.s32 40, %v1470_v24 }
  0x3b   : > { %1122 = vmatmul.mubr.msk.bf16.gmra.mrb[12].mxu0 %vm399_vm1, %v389_v10  ;;  %v683_v32 = vadd.s32 %v1474_v26, %v649_v25  ;;  %v681_v33 = vadd.s32 %v1474_v26, %v1470_v24  ;;  %v684_v34 = vadd.s32 %v1474_v26, %v650_v3  ;;  %v682_v35 = vadd.s32 %v1474_v26, %v648_v27 }
  0x3c   : > { %v1488_v36 = vadd.s32 %v1474_v26, %v653_v28  ;;  %v1491_v37 = vadd.s32 %v1474_v26, %v651_v29  ;;  %v657_v38 = vadd.s32 80, %v1470_v24  ;;  %v655_v39 = vadd.s32 64, %v1470_v24 }
  0x3d   : > { %v658_v40 = vadd.s32 88, %v1470_v24  ;;  %v1504_v41 = vadd.s32 %v1474_v26, %v654_v30  ;;  %v1507_v42 = vadd.s32 %v1474_v26, %v652_v31  ;;  %vm715_vm3 = vcmp.lt.s32.totalorder %v683_v32, 512 }
  0x3e   : > { %vm713_vm4 = vcmp.lt.s32.totalorder %v681_v33, 512  ;;  %v656_v43 = vadd.s32 72, %v1470_v24  ;;  %vm716_vm5 = vcmp.lt.s32.totalorder %v684_v34, 512  ;;  %vm714_vm6 = vcmp.lt.s32.totalorder %v682_v35, 512 }
  0x3f   : > { %1134 = vmatmul.mubr.msk.bf16.gmra.mrb[8].mxu1 %vm399_vm1, %v395_v17  ;;  %vm719_vm7 = vcmp.lt.s32.totalorder %v1488_v36, 512  ;;  %vm717_vm8 = vcmp.lt.s32.totalorder %v1491_v37, 512  ;;  %v1515_v46 = vadd.s32 %v1474_v26, %v657_v38  ;;  %v1518_v47 = vadd.s32 %v1474_v26, %v655_v39 }
  0x40   : > { %1137 = vmatprep.mubr.msk.bf16.mxu1 %vm399_vm1, %v396_v20  ;;  %v1521_v48 = vadd.s32 %v1474_v26, %v658_v40  ;;  %vm720_vm9 = vcmp.lt.s32.totalorder %v1504_v41, 512  ;;  %vm718_vm10 = vcmp.lt.s32.totalorder %v1507_v42, 512  ;;  %v661_v52 = vadd.s32 112, %v1470_v24 }
  0x41   : > { %v659_v53 = vadd.s32 96, %v1470_v24  ;;  %v1533_v57 = vadd.s32 %v1474_v26, %v656_v43  ;;  %v662_v58 = vadd.s32 120, %v1470_v24  ;;  %v660_v60 = vadd.s32 104, %v1470_v24 }
  0x42   : > { %v665_v61 = vadd.s32 144, %v1470_v24  ;;  %v663_v62 = vadd.s32 128, %v1470_v24  ;;  %v1545_v7 = vadd.s32 %v1474_v26, %v661_v52  ;;  %vm723_vm11 = vcmp.lt.s32.totalorder %v1515_v46, 512 }
  0x43   : > { %v1548_v8 = vadd.s32 %v1474_v26, %v659_v53  ;;  %vm721_vm12 = vcmp.lt.s32.totalorder %v1518_v47, 512  ;;  %v1556_v11 = vadd.s32 %v1474_v26, %v662_v58  ;;  %v1559_v16 = vadd.s32 %v1474_v26, %v660_v60 }
  0x44   : > { %v666_v17 = vadd.s32 152, %v1470_v24  ;;  %vm722_vm13 = vcmp.lt.s32.totalorder %v1533_v57, 512  ;;  %v1567_v20 = vadd.s32 %v1474_v26, %v665_v61  ;;  %v1570_v21 = vadd.s32 %v1474_v26, %v663_v62 }
  0x45   : > { %v664_v22 = vadd.s32 136, %v1470_v24  ;;  %vm724_vm14 = vcmp.lt.s32.totalorder %v1521_v48, 512  ;;  %v669_v35 = vadd.s32 176, %v1470_v24  ;;  %v667_v36 = vadd.s32 160, %v1470_v24 }
  0x46   : > { %v1588_v34 = vadd.s32 %v1474_v26, %v666_v17  ;;  %vm727_vm15 = vcmp.lt.s32.totalorder %v1545_v7, 512  ;;  %vm725_vm0 = vcmp.lt.s32.totalorder %v1548_v8, 512  ;;  %v670_v53 = vadd.s32 184, %v1470_v24 }
  0x47   : > { %1138 = vmatmul.mubr.msk.bf16.gmra.mrb[12].mxu1 %vm399_vm1, %v397_v2  ;;  %v1613_v42 = vadd.s32 %v1474_v26, %v664_v22  ;;  %v1625_v61 = vadd.s32 %v1474_v26, %v669_v35  ;;  %vm726_vm1 = vcmp.lt.s32.totalorder %v1559_v16, 512  ;;  %v674_v22 = vadd.s32 216, %v1470_v24 }
  0xf6   : > { %v1111_v44 = vpop.f32.mrb[0].mxu0 }
  0xf7   : > { %616 = vst.msk [vmem:[%s1501_s25 + $0x10] sm:$0xff] %vm613_vm2, %v1111_v44  ;;  %v486_v45 = vpop.f32.mrb[1].mxu0  ;;  %v747_v49 = vsel %vm715_vm3, %v1111_v44, 0.0  ;;  %vm729_vm3 = vcmp.lt.s32.totalorder %v1570_v21, 512 }
  0xf8   : > { %614 = vst.msk [vmem:[%s1501_s25] sm:$0xff] %vm613_vm2, %v486_v45  ;;  %v745_v50 = vsel %vm713_vm4, %v486_v45, 0.0  ;;  %v1112_v51 = vpop.f32.mrb[2].mxu0  ;;  %v848_v63 = vmul.f32 %v747_v49, %v747_v49  ;;  %v780_v9 = vsel %vm613_vm2, %v747_v49, 0.0  ;;  %vm728_vm4 = vcmp.lt.s32.totalorder %v1556_v11, 512 }
  0xf9   : > { %v846_v54 = vmul.f32 %v745_v50, %v745_v50  ;;  %617 = vst.msk [vmem:[%s1501_s25 + $0x18] sm:$0xff] %vm613_vm2, %v1112_v51  ;;  %v748_v55 = vsel %vm716_vm5, %v1112_v51, 0.0  ;;  %v489_v56 = vpop.f32.mrb[3].mxu0  ;;  %v777_v0 = vsel %vm613_vm2, %v745_v50, 0.0  ;;  %vm731_vm5 = vcmp.lt.s32.totalorder %v1567_v20, 512 }
  0xfa   : > { %615 = vst.msk [vmem:[%s1501_s25 + $0x8] sm:$0xff] %vm613_vm2, %v489_v56  ;;  %v746_v59 = vsel %vm714_vm6, %v489_v56, 0.0  ;;  %v849_v5 = vmul.f32 %v748_v55, %v748_v55  ;;  %v881_v18 = vsel %vm613_vm2, %v848_v63, 0.0  ;;  %v782_v2 = vsel %vm613_vm2, %v748_v55, 0.0 }
  0xfb   : > { %v778_v1 = vsel %vm613_vm2, %v746_v59, 0.0  ;;  %v847_v4 = vmul.f32 %v746_v59, %v746_v59  ;;  %v878_v10 = vsel %vm613_vm2, %v846_v54, 0.0  ;;  %v668_v54 = vadd.s32 168, %v1470_v24 }
  0xfc   : > { %v779_v6 = vadd.f32 %v778_v1, %v777_v0  ;;  %v883_v23 = vsel %vm613_vm2, %v849_v5, 0.0  ;;  %v1635_v1 = vadd.s32 %v1474_v26, %v667_v36  ;;  %vm730_vm6 = vcmp.lt.s32.totalorder %v1613_v42, 512 }
  0xfd   : > { %v879_v12 = vsel %vm613_vm2, %v847_v4, 0.0  ;;  %v673_v4 = vadd.s32 208, %v1470_v24  ;;  %v1679_v35 = vadd.s32 %v1474_v26, %v668_v54  ;;  %v672_v36 = vadd.s32 200, %v1470_v24 }
  0xfe   : > { %v781_v13 = vadd.f32 %v780_v9, %v779_v6  ;;  %v880_v14 = vadd.f32 %v879_v12, %v878_v10  ;;  %v1115_v15 = vpop.f32.mrb[4].mxu0  ;;  %v1702_v54 = vadd.s32 %v1474_v26, %v674_v22 }
  0xff   : > { %620 = vst.msk [vmem:[%s1501_s25 + $0x30] sm:$0xff] %vm613_vm2, %v1115_v15  ;;  %v502_v19 = vpop.f32.mrb[5].mxu0  ;;  %v751_v28 = vsel %vm719_vm7, %v1115_v15, 0.0  ;;  %vm732_vm7 = vcmp.lt.s32.totalorder %v1588_v34, 512  ;;  %v675_v34 = vadd.s32 224, %v1470_v24 }
 0x100   : > { %v882_v25 = vadd.f32 %v881_v18, %v880_v14  ;;  %618 = vst.msk [vmem:[%s1501_s25 + $0x20] sm:$0xff] %vm613_vm2, %v502_v19  ;;  %v749_v3 = vsel %vm717_vm8, %v502_v19, 0.0  ;;  %v1116_v27 = vpop.f32.mrb[6].mxu0  ;;  %v783_v29 = vadd.f32 %v782_v2, %v781_v13  ;;  %v852_v44 = vmul.f32 %v751_v28, %v751_v28 }
 0x101   : > { %v784_v30 = vsel %vm613_vm2, %v749_v3, 0.0  ;;  %v850_v31 = vmul.f32 %v749_v3, %v749_v3  ;;  %621 = vst.msk [vmem:[%s1501_s25 + $0x38] sm:$0xff] %vm613_vm2, %v1116_v27  ;;  %v505_v32 = vpop.f32.mrb[7].mxu0  ;;  %v752_v39 = vsel %vm720_vm9, %v1116_v27, 0.0  ;;  %v788_v55 = vsel %vm613_vm2, %v751_v28, 0.0 }
 0x102   : > { %v884_v33 = vadd.f32 %v883_v23, %v882_v25  ;;  %619 = vst.msk [vmem:[%s1501_s25 + $0x28] sm:$0xff] %vm613_vm2, %v505_v32  ;;  %v785_v37 = vadd.f32 %v784_v30, %v783_v29  ;;  %v750_v40 = vsel %vm718_vm10, %v505_v32, 0.0  ;;  %v1597_v43 = vpop.f32.mrb[0].mxu1  ;;  %v853_v56 = vmul.f32 %v752_v39, %v752_v39 }
 0x103   : > { %v885_v38 = vsel %vm613_vm2, %v850_v31, 0.0  ;;  %v786_v49 = vsel %vm613_vm2, %v750_v40, 0.0  ;;  %v851_v50 = vmul.f32 %v750_v40, %v750_v40  ;;  %632 = vst.msk [vmem:[%s1501_s25 + $0x90] sm:$0xff] %vm613_vm2, %v1597_v43  ;;  %v1603_v51 = vpop.f32.mrb[1].mxu1  ;;  %v889_v5 = vsel %vm613_vm2, %v852_v44, 0.0 }
 0x104   : > { %v886_v45 = vadd.f32 %v885_v38, %v884_v33  ;;  %v787_v52 = vadd.f32 %v786_v49, %v785_v37  ;;  %630 = vst.msk [vmem:[%s1501_s25 + $0x80] sm:$0xff] %vm613_vm2, %v1603_v51  ;;  %v1610_v41 = vpop.f32.mrb[2].mxu1  ;;  %v790_v6 = vsel %vm613_vm2, %v752_v39, 0.0  ;;  %v891_v46 = vsel %vm613_vm2, %v853_v56, 0.0 }
 0x105   : > { %v887_v58 = vsel %vm613_vm2, %v851_v50, 0.0  ;;  %633 = vst.msk [vmem:[%s1501_s25 + $0x98] sm:$0xff] %vm613_vm2, %v1610_v41  ;;  %v1622_v60 = vpop.f32.mrb[3].mxu1  ;;  %v671_v19 = vadd.s32 192, %v1470_v24  ;;  %v1671_v31 = vadd.s32 %v1474_v26, %v670_v53  ;;  %vm733_vm8 = vcmp.lt.s32.totalorder %v1635_v1, 512 }
 0x106   : > { %v1119_v59 = vpop.f32.mrb[8].mxu0  ;;  %v789_v62 = vadd.f32 %v788_v55, %v787_v52  ;;  %v888_v63 = vadd.f32 %v887_v58, %v886_v45  ;;  %631 = vst.msk [vmem:[%s1501_s25 + $0x88] sm:$0xff] %vm613_vm2, %v1622_v60  ;;  %v1690_v45 = vadd.s32 %v1474_v26, %v673_v4  ;;  %vm734_vm9 = vcmp.lt.s32.totalorder %v1679_v35, 512 }
 0x107   : > { %624 = vst.msk [vmem:[%s1501_s25 + $0x50] sm:$0xff] %vm613_vm2, %v1119_v59  ;;  %v518_v0 = vpop.f32.mrb[9].mxu0  ;;  %v755_v9 = vsel %vm723_vm11, %v1119_v59, 0.0  ;;  %v1699_v53 = vadd.s32 %v1474_v26, %v671_v19  ;;  %v763_v11 = vsel %vm731_vm5, %v1597_v43, 0.0  ;;  %vm735_vm10 = vcmp.lt.s32.totalorder %v1625_v61, 512 }
 0x108   : > { %622 = vst.msk [vmem:[%s1501_s25 + $0x40] sm:$0xff] %vm613_vm2, %v518_v0  ;;  %v753_v10 = vsel %vm721_vm12, %v518_v0, 0.0  ;;  %v1120_v12 = vpop.f32.mrb[10].mxu0  ;;  %v890_v13 = vadd.f32 %v889_v5, %v888_v63  ;;  %v791_v14 = vadd.f32 %v790_v6, %v789_v62  ;;  %v856_v28 = vmul.f32 %v755_v9, %v755_v9 }
 0x109   : > { %v792_v15 = vsel %vm613_vm2, %v753_v10, 0.0  ;;  %v854_v17 = vmul.f32 %v753_v10, %v753_v10  ;;  %625 = vst.msk [vmem:[%s1501_s25 + $0x58] sm:$0xff] %vm613_vm2, %v1120_v12  ;;  %v521_v18 = vpop.f32.mrb[11].mxu0  ;;  %v756_v3 = vsel %vm724_vm14, %v1120_v12, 0.0  ;;  %v796_v37 = vsel %vm613_vm2, %v755_v9, 0.0 }
 0x10a   : > { %623 = vst.msk [vmem:[%s1501_s25 + $0x48] sm:$0xff] %vm613_vm2, %v521_v18  ;;  %v754_v47 = vsel %vm722_vm13, %v521_v18, 0.0  ;;  %v793_v2 = vadd.f32 %v792_v15, %v791_v14  ;;  %v892_v23 = vadd.f32 %v891_v46, %v890_v13  ;;  %v1661_v27 = vpop.f32.mrb[4].mxu1  ;;  %v857_v38 = vmul.f32 %v756_v3, %v756_v3 }
 0x10b   : > { %v893_v25 = vsel %vm613_vm2, %v854_v17, 0.0  ;;  %v794_v57 = vsel %vm613_vm2, %v754_v47, 0.0  ;;  %v855_v29 = vmul.f32 %v754_v47, %v754_v47  ;;  %636 = vst.msk [vmem:[%s1501_s25 + $0xb0] sm:$0xff] %vm613_vm2, %v1661_v27  ;;  %v1668_v30 = vpop.f32.mrb[5].mxu1  ;;  %v897_v55 = vsel %vm613_vm2, %v856_v28, 0.0 }
 0x10c   : > { %v894_v48 = vadd.f32 %v893_v25, %v892_v23  ;;  %v795_v32 = vadd.f32 %v794_v57, %v793_v2  ;;  %634 = vst.msk [vmem:[%s1501_s25 + $0xa0] sm:$0xff] %vm613_vm2, %v1668_v30  ;;  %v1676_v33 = vpop.f32.mrb[6].mxu1  ;;  %v798_v56 = vsel %vm613_vm2, %v756_v3, 0.0  ;;  %v899_v7 = vsel %vm613_vm2, %v857_v38, 0.0 }
 0x10d   : > { %v895_v39 = vsel %vm613_vm2, %v855_v29, 0.0  ;;  %637 = vst.msk [vmem:[%s1501_s25 + $0xb8] sm:$0xff] %vm613_vm2, %v1676_v33  ;;  %v1687_v44 = vpop.f32.mrb[7].mxu1  ;;  %v761_v9 = vsel %vm729_vm3, %v1603_v51, 0.0  ;;  %v677_v10 = vadd.s32 240, %v1470_v24  ;;  %v678_v51 = vadd.s32 248, %v1470_v24 }
 0x10e   : > { %v1123_v40 = vpop.f32.mrb[12].mxu0  ;;  %v797_v49 = vadd.f32 %v796_v37, %v795_v32  ;;  %v896_v50 = vadd.f32 %v895_v39, %v894_v48  ;;  %635 = vst.msk [vmem:[%s1501_s25 + $0xa8] sm:$0xff] %vm613_vm2, %v1687_v44  ;;  %v1748_v2 = vadd.s32 %v1474_v26, %v672_v36  ;;  %v862_v28 = vmul.f32 %v761_v9, %v761_v9 }
 0x10f   : > { %628 = vst.msk [vmem:[%s1501_s25 + $0x70] sm:$0xff] %vm613_vm2, %v1123_v40  ;;  %v534_v52 = vpop.f32.mrb[13].mxu0  ;;  %v759_v58 = vsel %vm727_vm15, %v1123_v40, 0.0  ;;  %vm736_vm11 = vcmp.lt.s32.totalorder %v1671_v31, 512  ;;  %v762_v29 = vsel %vm730_vm6, %v1622_v60, 0.0  ;;  %v711_v48 = vadd.s32 %v1474_v26, %v677_v10 }
 0x110   : > { %626 = vst.msk [vmem:[%s1501_s25 + $0x60] sm:$0xff] %vm613_vm2, %v534_v52  ;;  %v757_v59 = vsel %vm725_vm0, %v534_v52, 0.0  ;;  %v1124_v62 = vpop.f32.mrb[14].mxu0  ;;  %v898_v63 = vadd.f32 %v897_v55, %v896_v50  ;;  %v799_v0 = vadd.f32 %v798_v56, %v797_v49  ;;  %v860_v18 = vmul.f32 %v759_v58, %v759_v58 }
 0x111   : > { %v800_v4 = vsel %vm613_vm2, %v757_v59, 0.0  ;;  %v858_v5 = vmul.f32 %v757_v59, %v757_v59  ;;  %629 = vst.msk [vmem:[%s1501_s25 + $0x78] sm:$0xff] %vm613_vm2, %v1124_v62  ;;  %v537_v6 = vpop.f32.mrb[15].mxu0  ;;  %v760_v15 = vsel %vm728_vm4, %v1124_v62, 0.0  ;;  %v804_v23 = vsel %vm613_vm2, %v759_v58, 0.0 }
 0x112   : > { %627 = vst.msk [vmem:[%s1501_s25 + $0x68] sm:$0xff] %vm613_vm2, %v537_v6  ;;  %v758_v8 = vsel %vm726_vm1, %v537_v6, 0.0  ;;  %v801_v12 = vadd.f32 %v800_v4, %v799_v0  ;;  %v900_v13 = vadd.f32 %v899_v7, %v898_v63  ;;  %v1728_v17 = vpop.f32.mrb[8].mxu1  ;;  %v861_v25 = vmul.f32 %v760_v15, %v760_v15 }
 0x113   : > { %v901_v14 = vsel %vm613_vm2, %v858_v5, 0.0  ;;  %v802_v16 = vsel %vm613_vm2, %v758_v8, 0.0  ;;  %v859_v46 = vmul.f32 %v758_v8, %v758_v8  ;;  %640 = vst.msk [vmem:[%s1501_s25 + $0xd0] sm:$0xff] %vm613_vm2, %v1728_v17  ;;  %v1735_v21 = vpop.f32.mrb[9].mxu1  ;;  %v905_v32 = vsel %vm613_vm2, %v860_v18, 0.0 }
 0x114   : > { %v902_v47 = vadd.f32 %v901_v14, %v900_v13  ;;  %v803_v19 = vadd.f32 %v802_v16, %v801_v12  ;;  %638 = vst.msk [vmem:[%s1501_s25 + $0xc0] sm:$0xff] %vm613_vm2, %v1735_v21  ;;  %v1745_v22 = vpop.f32.mrb[10].mxu1  ;;  %v806_v36 = vsel %vm613_vm2, %v760_v15, 0.0  ;;  %v808_v37 = vsel %vm613_vm2, %v761_v9, 0.0 }
 0x115   : > { %v903_v3 = vsel %vm613_vm2, %v859_v46, 0.0  ;;  %641 = vst.msk [vmem:[%s1501_s25 + $0xd8] sm:$0xff] %vm613_vm2, %v1745_v22  ;;  %v1756_v20 = vpop.f32.mrb[11].mxu1  ;;  %v712_v38 = vadd.s32 %v1474_v26, %v678_v51  ;;  %v864_v40 = vmul.f32 %v763_v11, %v763_v11  ;;  %vm737_vm12 = vcmp.lt.s32.totalorder %v1699_v53, 512 }
 0x116   : > { %v805_v43 = vadd.f32 %v804_v23, %v803_v19  ;;  %v904_v57 = vadd.f32 %v903_v3, %v902_v47  ;;  %639 = vst.msk [vmem:[%s1501_s25 + $0xc8] sm:$0xff] %vm613_vm2, %v1756_v20  ;;  %v907_v42 = vsel %vm613_vm2, %v861_v25, 0.0  ;;  %v909_v60 = vsel %vm613_vm2, %v862_v28, 0.0 }
 0x117   : > { %v764_v50 = vsel %vm732_vm7, %v1610_v41, 0.0  ;;  %v863_v52 = vmul.f32 %v762_v29, %v762_v29  ;;  %v765_v58 = vsel %vm733_vm8, %v1668_v30, 0.0  ;;  %vm743_vm13 = vcmp.lt.s32.totalorder %v711_v48, 512 }
 0x118   : > { %v906_v39 = vadd.f32 %v905_v32, %v904_v57  ;;  %v807_v49 = vadd.f32 %v806_v36, %v805_v43  ;;  %v810_v62 = vsel %vm613_vm2, %v762_v29, 0.0  ;;  %vm738_vm14 = vcmp.lt.s32.totalorder %v1748_v2, 512 }
 0x119   : > { %vm744_vm15 = vcmp.lt.s32.totalorder %v712_v38, 512  ;;  %v676_v41 = vadd.s32 232, %v1470_v24  ;;  %v812_v0 = vsel %vm613_vm2, %v763_v11, 0.0  ;;  %v865_v30 = vmul.f32 %v764_v50, %v764_v50 }
 0x11a   : > { %v809_v55 = vadd.f32 %v808_v37, %v807_v49  ;;  %v908_v56 = vadd.f32 %v907_v42, %v906_v39  ;;  %v1139_v59 = vpop.f32.mrb[12].mxu1  ;;  %v913_v6 = vsel %vm613_vm2, %v864_v40, 0.0  ;;  %v911_v7 = vsel %vm613_vm2, %v863_v52, 0.0 }
 0x11b   : > { %644 = vst.msk [vmem:[%s1501_s25 + $0xf0] sm:$0xff] %vm613_vm2, %v1139_v59  ;;  %v1782_v63 = vpop.f32.mrb[13].mxu1  ;;  %v866_v8 = vmul.f32 %v765_v58, %v765_v58  ;;  %vm739_vm0 = vcmp.lt.s32.totalorder %v1690_v45, 512  ;;  %v775_v9 = vsel %vm743_vm13, %v1139_v59, 0.0  ;;  %v814_v10 = vsel %vm613_vm2, %v764_v50, 0.0 }
 0x11c   : > { %v910_v1 = vadd.f32 %v909_v60, %v908_v56  ;;  %v811_v4 = vadd.f32 %v810_v62, %v809_v55  ;;  %642 = vst.msk [vmem:[%s1501_s25 + $0xe0] sm:$0xff] %vm613_vm2, %v1782_v63  ;;  %v1140_v5 = vpop.f32.mrb[14].mxu1  ;;  %v766_v14 = vsel %vm734_vm9, %v1687_v44, 0.0  ;;  %v767_v15 = vsel %vm735_vm10, %v1661_v27, 0.0 }
 0x11d   : > { %645 = vst.msk [vmem:[%s1501_s25 + $0xf8] sm:$0xff] %vm613_vm2, %v1140_v5  ;;  %v1796_v24 = vpop.f32.mrb[15].mxu1  ;;  %v816_v18 = vsel %vm613_vm2, %v765_v58, 0.0  ;;  %v1810_v16 = vsel %vm613_vm2, %v775_v9, 0.0  ;;  %v876_v46 = vmul.f32 %v775_v9, %v775_v9  ;;  %v915_v51 = vsel %vm613_vm2, %v865_v30, 0.0 }
 0x11e   : > { %v813_v12 = vadd.f32 %v812_v0, %v811_v4  ;;  %v912_v13 = vadd.f32 %v911_v7, %v910_v1  ;;  %643 = vst.msk [vmem:[%s1501_s25 + $0xe8] sm:$0xff] %vm613_vm2, %v1796_v24  ;;  %v768_v35 = vsel %vm736_vm11, %v1676_v33, 0.0  ;;  %v917_v44 = vsel %vm613_vm2, %v866_v8, 0.0 }
 0x11f   : > { %v867_v11 = vmul.f32 %v766_v14, %v766_v14  ;;  %v1818_v61 = vsel %vm613_vm2, %v876_v46, 0.0  ;;  %v776_v27 = vsel %vm744_vm15, %v1140_v5, 0.0  ;;  %v769_v3 = vsel %vm737_vm12, %v1735_v21, 0.0 }
 0x120   : > { %v914_v47 = vadd.f32 %v913_v6, %v912_v13  ;;  %v815_v19 = vadd.f32 %v814_v10, %v813_v12  ;;  %v838_v28 = vsel %vm613_vm2, %v776_v27, 0.0  ;;  %v868_v43 = vmul.f32 %v767_v15, %v767_v15 }
 0x121   : > { %v818_v31 = vsel %vm613_vm2, %v766_v14, 0.0  ;;  %v709_v33 = vadd.s32 %v1474_v26, %v675_v34  ;;  %v877_v57 = vmul.f32 %v776_v27, %v776_v27  ;;  %v820_v29 = vsel %vm613_vm2, %v767_v15, 0.0 }
 0x122   : > { %v817_v23 = vadd.f32 %v816_v18, %v815_v19  ;;  %v916_v25 = vadd.f32 %v915_v51, %v914_v47  ;;  %vm740_vm1 = vcmp.lt.s32.totalorder %v1702_v54, 512  ;;  %v869_v36 = vmul.f32 %v768_v35, %v768_v35 }
 0x123   : > { %v919_v37 = vsel %vm613_vm2, %v867_v11, 0.0  ;;  %v870_v38 = vmul.f32 %v769_v3, %v769_v3  ;;  %v939_v53 = vsel %vm613_vm2, %v877_v57, 0.0  ;;  %v770_v40 = vsel %vm738_vm14, %v1756_v20, 0.0 }
 0x124   : > { %v918_v48 = vadd.f32 %v917_v44, %v916_v25  ;;  %v819_v32 = vadd.f32 %v818_v31, %v817_v23  ;;  %v710_v49 = vadd.s32 %v1474_v26, %v676_v41  ;;  %v921_v42 = vsel %vm613_vm2, %v868_v43, 0.0 }
 0x125   : > { %v822_v60 = vsel %vm613_vm2, %v768_v35, 0.0  ;;  %v824_v50 = vsel %vm613_vm2, %v769_v3, 0.0  ;;  %vm741_vm3 = vcmp.lt.s32.totalorder %v709_v33, 512  ;;  %v771_v55 = vsel %vm739_vm0, %v1728_v17, 0.0 }
 0x126   : > { %v821_v21 = vadd.f32 %v820_v29, %v819_v32  ;;  %v920_v39 = vadd.f32 %v919_v37, %v918_v48  ;;  %v923_v58 = vsel %vm613_vm2, %v869_v36, 0.0  ;;  %v925_v2 = vsel %vm613_vm2, %v870_v38, 0.0 }
 0x127   : > { %v871_v20 = vmul.f32 %v770_v40, %v770_v40  ;;  %v772_v62 = vsel %vm740_vm1, %v1745_v22, 0.0  ;;  %v773_v34 = vsel %vm741_vm3, %v1782_v63, 0.0  ;;  %v872_v41 = vmul.f32 %v771_v55, %v771_v55 }
 0x128   : > { %v922_v52 = vadd.f32 %v921_v42, %v920_v39  ;;  %v823_v56 = vadd.f32 %v822_v60, %v821_v21  ;;  %v826_v0 = vsel %vm613_vm2, %v770_v40, 0.0  ;;  %vm742_vm4 = vcmp.lt.s32.totalorder %v710_v49, 512 }
 0x129   : > { %v828_v1 = vsel %vm613_vm2, %v771_v55, 0.0  ;;  %v873_v30 = vmul.f32 %v772_v62, %v772_v62  ;;  %v927_v4 = vsel %vm613_vm2, %v871_v20, 0.0  ;;  %v874_v5 = vmul.f32 %v773_v34, %v773_v34 }
 0x12a   : > { %v825_v59 = vadd.f32 %v824_v50, %v823_v56  ;;  %v924_v26 = vadd.f32 %v923_v58, %v922_v52  ;;  %v774_v8 = vsel %vm742_vm4, %v1796_v24, 0.0  ;;  %v929_v54 = vsel %vm613_vm2, %v872_v41, 0.0 }
 0x12b   : > { %v830_v22 = vsel %vm613_vm2, %v772_v62, 0.0  ;;  %v832_v63 = vsel %vm613_vm2, %v773_v34, 0.0  ;;  %v931_v12 = vsel %vm613_vm2, %v873_v30, 0.0  ;;  %v933_v13 = vsel %vm613_vm2, %v874_v5, 0.0 }
 0x12c   : > { %v926_v45 = vadd.f32 %v925_v2, %v924_v26  ;;  %v827_v17 = vadd.f32 %v826_v0, %v825_v59  ;;  %v875_v14 = vmul.f32 %v774_v8, %v774_v8  ;;  %v834_v46 = vsel %vm613_vm2, %v774_v8, 0.0 }
 0x12d   : > { %vm949_vm5 = vcmask 123904  }
 0x12e   : > { %v829_v6 = vadd.f32 %v828_v1, %v827_v17  ;;  %v928_v7 = vadd.f32 %v927_v4, %v926_v45  ;;  %v935_v47 = vsel %vm613_vm2, %v875_v14, 0.0  ;;  %vm947_vm2 = vcmask 1040384  }
 0x130   : > { %v930_v9 = vadd.f32 %v929_v54, %v928_v7  ;;  %v831_v10 = vadd.f32 %v830_v22, %v829_v6 }
 0x132   : > { %v833_v15 = vadd.f32 %v832_v63, %v831_v10  ;;  %v932_v18 = vadd.f32 %v931_v12, %v930_v9 }
 0x134   : > { %v934_v51 = vadd.f32 %v933_v13, %v932_v18  ;;  %v835_v24 = vadd.f32 %v834_v46, %v833_v15 }
 0x136   : > { %v837_v19 = vadd.f32 %v1810_v16, %v835_v24  ;;  %v936_v35 = vadd.f32 %v935_v47, %v934_v51 }
 0x138   : > { %v839_v44 = vadd.f32 %v838_v28, %v837_v19  ;;  %v938_v11 = vadd.f32 %v1818_v61, %v936_v35 }
 0x13a   : > { %v840_v27 = vrot.slane %v839_v44, 4  ;;  %v940_v23 = vadd.f32 %v939_v53, %v938_v11 }
 0x13c   : > { %v841_v25 = vadd.f32 %v840_v27, %v839_v44  ;;  %v941_v3 = vrot.slane %v940_v23, 4 }
 0x13e   : > { %v842_v43 = vrot.slane %v841_v25, 2  ;;  %v942_v31 = vadd.f32 %v941_v3, %v940_v23 }
 0x140   : > { %v843_v33 = vadd.f32 %v842_v43, %v841_v25  ;;  %v943_v57 = vrot.slane %v942_v31, 2 }
 0x142   : > { %v844_v29 = vrot.slane %v843_v33, 1  ;;  %v944_v48 = vadd.f32 %v943_v57, %v942_v31 }
 0x144   : > { %v945_v32 = vrot.slane %v944_v48, 1  ;;  %v845_v16 = vadd.f32 %v844_v29, %v843_v33 }
 0x146   : > { %v946_v61 = vadd.f32 %v945_v32, %v944_v48 }
 0x148   : > { %v948_v28 = vsel %vm947_vm2, %v845_v16, %v946_v61 }
 0x149   : > { %950 = vst.msk [vmem:[%s226_s6] sm:$0x3] %vm949_vm5, %v948_v28 }
 0x14a   : > { %1197 = shalt.err (!%p1194_p3)
}
 0x14b   : > { %s1198_s7 = scalar_lea.hbm %s1865_s11, 32  ;;  %s1202_s23 = scalar_lea.hbm %s1912_s5, 64 }
 0x14c   : > { %p1199_p4 = scmp.ne.s32.totalorder %s1865_s11, %s1198_s7  ;;  %p1203_p9 = scmp.lt.u32.totalorder %s1865_s11, %s1912_s5 }
 0x14d   : > { %p1204_p10 = scmp.lt.u32.totalorder %s1202_s23, %s1198_s7  ;;  %p1206_p12 = scmp.lt.u32.totalorder %s1198_s7, %s1865_s11 }
 0x14e   : > { %p1200_p7 = pnand %p1199_p4, %p1317_p5 }
 0x14f   : > { %p1205_p11 = por %p1204_p10, %p1203_p9 }
 0x150   : > { %p1201_p8 = pneg %p1200_p7 }
 0x151   : > { %p1207_p13 = por %p1206_p12, %p1205_p11 }
 0x153   : > { %p1208_p0 = pnand %p1207_p13, %p1201_p8 }
 0x155   : > { %1211 = shalt.err (!%p1208_p0)
}
 0x156   : > { %1145 = dma.vmem_to_hbm [thread:$0]  (%p1317_p5), %s1867_s8, 32, %s1865_s11, %s957_s12  }
 0x157 PF: > { %p1151_p1 = scmp.ge.s32.totalorder %s1246_s21, 2  ;;  %s994_s30 = sand.u32 1, %s1234_s18  }
 0x158   : > { %s995_s6 = scalar_lea.sflag [#allocation3], %s994_s30 }
 0x159   : > { %p1148_p2 = pnand %p1151_p1, %p1321_p6 }
 0x15b   : > { %1229 = dma.done.wait (!%p1148_p2), %s995_s6, 32  }
 0x15c   : > { %1231 = vsyncadd (!%p1148_p2), %s995_s6, 4294967264  ;;  %p16_p3 = scmp.ge.s32.totalorder %s1304_s24, 4   ;;  %s1915_s18 = smov %s1238_s19 }
 0x15d   : > { %s1916_s19 = smov %s1242_s20  ;;  %s1917_s20 = smov %s1315_s27 }
 0x15e   : > { %s1918_s21 = smov %s1304_s24  ;;  %18 = sbr.rel (!%p16_p3) target bundleno = 3 (0x3), region = 83 }
 0x165   :  { %1000 = vsyncpa [#allocation3], 1 }
 0x166   :  { %1002 = vsyncpa [#allocation3 + $0x1], 1 }

</bundles_post_ra>
